<compile_context>
chip_gen: v5e
topology: v5e:2x2
jax: 0.10.0
libtpu: 0.0.40
codegen_flags: <defaults>
</compile_context>

<pallas_src>
import functools

import jax
import jax.numpy as jnp
from jax import lax
from jax.experimental import pallas as pl
from jax.experimental.pallas import tpu as pltpu

_EPS = 1e-12  # F.normalize default eps


def _round_up(x, m):
    return ((x + m - 1) // m) * m


def _compute_tile(x_ref, w_ref, wmu_ref):
    """Per-tile hot path: one wide matmul -> L2 norm -> 2-view fusion."""
    final_dim = wmu_ref.shape[-1]

    # Single MXU matmul for BOTH views (w_ref = [F_in, 2*final_dim]); x is cast
    # to the weight dtype (bf16 on the perf path) at the MXU input, f32 accum.
    x = x_ref[...].astype(w_ref.dtype)
    both = jnp.dot(x, w_ref[...], preferred_element_type=jnp.float32)
    agg = both[:, :final_dim]
    ff = both[:, final_dim:]

    # F.normalize(p=2, dim=1, eps=1e-12):
    #   v / max(||v||, eps) == v * rsqrt(max(||v||^2, eps^2))   (sqrt monotone)
    agg_n = agg * lax.rsqrt(
        jnp.maximum(jnp.sum(agg * agg, axis=-1, keepdims=True), _EPS * _EPS))
    ff_n = ff * lax.rsqrt(
        jnp.maximum(jnp.sum(ff * ff, axis=-1, keepdims=True), _EPS * _EPS))

    # mu scores: VPU multiply + cross-lane reduce (avoids a 1-wide MXU matmul).
    w_mu = wmu_ref[...]                                      # [1, final_dim] f32
    s_agg = jnp.sum(agg_n * w_mu, axis=-1, keepdims=True)    # [bn, 1]
    s_ff = jnp.sum(ff_n * w_mu, axis=-1, keepdims=True)      # [bn, 1]

    # 2-way softmax == sigmoid of the score difference.  Exact math (no
    # approximate reciprocal) -- this fixed the previous `contexts` mismatch.
    coef_a = 1.0 / (1.0 + jnp.exp(s_ff - s_agg))
    coef_f = 1.0 - coef_a
    fused = coef_a * agg_n + coef_f * ff_n
    return fused, agg_n, ff_n


def _fused_only_kernel(x_ref, w_ref, wmu_ref, fused_ref):
    fused, _, _ = _compute_tile(x_ref, w_ref, wmu_ref)
    fused_ref[...] = fused


def _fused_and_views_kernel(x_ref, w_ref, wmu_ref, fused_ref, agg_ref, ff_ref):
    fused, agg_n, ff_n = _compute_tile(x_ref, w_ref, wmu_ref)
    fused_ref[...] = fused
    agg_ref[...] = agg_n
    ff_ref[...] = ff_n


def _branch_call(x, w_both, w_mu_row, *, with_views, block_n):
    """One pallas_call over one source (no concat, no pad, no post-slicing)."""
    n, f_in = x.shape
    final_dim = w_mu_row.shape[-1]

    # Row tile: as large as requested, clamped for tiny inputs.  Pallas handles
    # a partially out-of-bounds last block (rows are independent; OOB writes
    # are discarded), so no wrapper-side padding / extra HBM traffic.
    bn = min(block_n, _round_up(n, 8))
    grid = (pl.cdiv(n, bn),)

    tiled = lambda i: (i, 0)
    full = lambda i: (0, 0)

    out_sds = jax.ShapeDtypeStruct((n, final_dim), jnp.float32)
    # NOTE: final_dim < 128 makes these masked (vst.msk) stores; we keep the
    # separate outputs because downstream consumes them as separate dict
    # entries (packing + wrapper slices would re-read the whole slab from HBM).
    out_spec = pl.BlockSpec((bn, final_dim), tiled)

    if with_views:
        kernel = _fused_and_views_kernel
        out_shape = (out_sds, out_sds, out_sds)
        out_specs = (out_spec, out_spec, out_spec)
    else:
        kernel = _fused_only_kernel
        out_shape = out_sds
        out_specs = out_spec

    return pl.pallas_call(
        kernel,
        out_shape=out_shape,
        grid_spec=pltpu.PrefetchScalarGridSpec(
            num_scalar_prefetch=0,
            grid=grid,
            in_specs=[
                pl.BlockSpec((bn, f_in), tiled),
                # Weight blocks: index never changes -> DMA'd once and held
                # resident across the row grid.
                # TODO(synk): pipeline_mode=pl.Buffered(1) would halve their
                # VMEM footprint; only matters once F_in*final_dim gets large.
                pl.BlockSpec((f_in, 2 * final_dim), full),
                pl.BlockSpec((1, final_dim), full),
            ],
            out_specs=out_specs,
        ),
        compiler_params=pltpu.CompilerParams(
            dimension_semantics=("parallel",)),
    )(x, w_both, w_mu_row)


def _prep_weights(params, use_bf16):
    # Fold view_output (modeled as two bias-free linears) with agg/ff weights,
    # then pack BOTH views into one [F_in, 2*final_dim] RHS so the kernel does
    # a single MXU matmul per tile.  One-time tiny XLA matmuls in the wrapper.
    w_agg_fused = jnp.dot(params["w_view_agg"], params["w_agg"])
    w_ff_fused = jnp.dot(params["w_view_ff"], params["w_ff"])
    w_both = jnp.concatenate([w_agg_fused, w_ff_fused], axis=1)
    w_both = w_both.astype(jnp.bfloat16 if use_bf16 else jnp.float32)
    w_mu_row = params["w_mu"].T.astype(jnp.float32)          # [1, final_dim]
    return w_both, w_mu_row


def _multiview_forward_impl(nodes, contexts, neg_samples, params,
                            block_n=512, use_bf16=True):
    """Mirrors MultiviewModel.forward (view_selection=True, output_norm=True)."""
    w_both, w_mu_row = _prep_weights(params, use_bf16)

    output = {"nodes": None, "nodes_agg": None, "nodes_ff": None,
              "contexts": None, "neg": None}
    if nodes is not None:
        fused, agg_n, ff_n = _branch_call(
            nodes, w_both, w_mu_row, with_views=True, block_n=block_n)
        output.update({"nodes": fused, "nodes_agg": agg_n, "nodes_ff": ff_n})
    if contexts is not None:
        output["contexts"] = _branch_call(
            contexts, w_both, w_mu_row, with_views=False, block_n=block_n)
    if neg_samples is not None:
        output["neg"] = _branch_call(
            neg_samples, w_both, w_mu_row, with_views=False, block_n=block_n)

    # attention coefficients are always (None, None) in the reference forward
    return output, None, None


multiview_forward = functools.partial(
    jax.jit, static_argnames=("block_n", "use_bf16"))(_multiview_forward_impl)


def _reference_branch(x, params):
    """Pure-JAX f32 reference of the original (un-fused) math."""
    agg = x @ params["w_view_agg"] @ params["w_agg"]
    ff = x @ params["w_view_ff"] @ params["w_ff"]
    agg = agg / jnp.maximum(jnp.linalg.norm(agg, axis=1, keepdims=True), _EPS)
    ff = ff / jnp.maximum(jnp.linalg.norm(ff, axis=1, keepdims=True), _EPS)
    stacked = jnp.stack((agg, ff), axis=1)                   # [N, 2, final]
    scores = stacked @ params["w_mu"]                        # [N, 2, 1]
    coef = jax.nn.softmax(scores, axis=1)
    return jnp.sum(coef * stacked, axis=1), agg, ff


if __name__ == "__main__":
    key = jax.random.PRNGKey(0)
    N, F_in, D, final_dim = 8, 32, 32, 16   # D == last_agg.output_dim

    ks = jax.random.split(key, 8)
    params = {
        "w_view_agg": jax.random.normal(ks[0], (F_in, D), jnp.float32) * 0.1,
        "w_view_ff":  jax.random.normal(ks[1], (F_in, D), jnp.float32) * 0.1,
        "w_agg":      jax.random.normal(ks[2], (D, final_dim), jnp.float32) * 0.1,
        "w_ff":       jax.random.normal(ks[3], (D, final_dim), jnp.float32) * 0.1,
        "w_mu":       jax.random.normal(ks[4], (final_dim, 1), jnp.float32) * 0.1,
    }
    nodes = jax.random.normal(ks[5], (N, F_in), jnp.float32)
    contexts = jax.random.normal(ks[6], (N, F_in), jnp.float32)
    neg_samples = jax.random.normal(ks[7], (N, F_in), jnp.float32)

    # Perf path: bf16 MXU inputs, f32 accumulation / normalize / fusion.
    out_bf16, _, _ = multiview_forward(nodes, contexts, neg_samples, params)
    jax.block_until_ready(out_bf16)

    # Validation path: identical kernel with f32 MXU inputs (exact math).
    out_f32, _, _ = multiview_forward(nodes, contexts, neg_samples, params,
                                      use_bf16=False)
    jax.block_until_ready(out_f32)

    ref_nodes, ref_agg, ref_ff = _reference_branch(nodes, params)
    ref_ctx, _, _ = _reference_branch(contexts, params)
    ref_neg, _, _ = _reference_branch(neg_samples, params)

    pairs_f32 = [(out_f32["nodes"], ref_nodes),
                 (out_f32["nodes_agg"], ref_agg),
                 (out_f32["nodes_ff"], ref_ff),
                 (out_f32["contexts"], ref_ctx),
                 (out_f32["neg"], ref_neg)]
    # f32 kernel: only rounding-order differences from pre-fused weights.
    for got, ref in pairs_f32:
        assert jnp.allclose(got, ref, rtol=1e-4, atol=1e-4)

    pairs_bf16 = [(out_bf16["nodes"], ref_nodes),
                  (out_bf16["nodes_agg"], ref_agg),
                  (out_bf16["nodes_ff"], ref_ff),
                  (out_bf16["contexts"], ref_ctx),
                  (out_bf16["neg"], ref_neg)]
    # bf16 MXU inputs: tolerance sized to bf16's ~2^-8 input rounding.
    for got, ref in pairs_bf16:
        assert jnp.allclose(got, ref, rtol=2e-2, atol=2e-2)

    print("KERNEL_OK")
</pallas_src>

<mosaic_0001>
module attributes {stable_mosaic.version = 11 : i64} {
  func.func @_fused_only_kernel(%arg0: i32, %arg1: memref<8x32xf32, #tpu.memory_space<vmem>>, %arg2: memref<32x32xbf16, #tpu.memory_space<vmem>>, %arg3: memref<1x16xf32, #tpu.memory_space<vmem>>, %arg4: memref<8x16xf32, #tpu.memory_space<vmem>>) attributes {dimension_semantics = [#tpu.dimension_semantics<parallel>], iteration_bounds = array<i64: 1>, scalar_prefetch = 0 : i64, scratch_operands = 0 : i64, tpu.core_type = #tpu.core_type<tc>, window_params = [{transform_indices = @transform_0, window_bounds = array<i64: 8, 32>}, {pipeline_mode = #tpu.pipeline_mode<synchronous>, transform_indices = @transform_1, window_bounds = array<i64: 32, 32>}, {pipeline_mode = #tpu.pipeline_mode<synchronous>, transform_indices = @transform_2, window_bounds = array<i64: 1, 16>}, {transform_indices = @transform_3, window_bounds = array<i64: 8, 16>}]} {
    %c0 = arith.constant 0 : index
    %c0_0 = arith.constant 0 : index
    %0 = vector.load %arg1[%c0, %c0_0] : memref<8x32xf32, #tpu.memory_space<vmem>>, vector<8x32xf32>
    %1 = arith.truncf %0 : vector<8x32xf32> to vector<8x32xbf16>
    %c0_1 = arith.constant 0 : index
    %c0_2 = arith.constant 0 : index
    %2 = vector.load %arg2[%c0_1, %c0_2] : memref<32x32xbf16, #tpu.memory_space<vmem>>, vector<32x32xbf16>
    %cst = arith.constant dense<0.000000e+00> : vector<8x32xf32>
    %3 = tpu.matmul %1, %2, %cst {dimension_numbers = #tpu.dot_dimension_numbers<[1], [0], [0], [1], [0, 0, 1, 1], [], []>} : vector<8x32xbf16>, vector<32x32xbf16>, vector<8x32xf32> -> vector<8x32xf32>
    %4 = vector.extract_strided_slice %3 {offsets = [0, 0], sizes = [8, 16], strides = [1, 1]} : vector<8x32xf32> to vector<8x16xf32>
    %5 = vector.extract_strided_slice %3 {offsets = [0, 16], sizes = [8, 16], strides = [1, 1]} : vector<8x32xf32> to vector<8x16xf32>
    %6 = arith.mulf %4, %4 : vector<8x16xf32>
    %cst_3 = arith.constant dense<0.000000e+00> : vector<8xf32>
    %7 = vector.multi_reduction <add>, %6, %cst_3 [1] : vector<8x16xf32> to vector<8xf32>
    %8 = vector.shape_cast %7 : vector<8xf32> to vector<8x1xf32>
    %cst_4 = arith.constant 1.000000e-24 : f32
    %9 = vector.broadcast %cst_4 : f32 to vector<8x1xf32>
    %10 = arith.maximumf %8, %9 : vector<8x1xf32>
    %11 = math.rsqrt %10 : vector<8x1xf32>
    %12 = vector.broadcast %11 : vector<8x1xf32> to vector<8x16xf32>
    %13 = arith.mulf %4, %12 : vector<8x16xf32>
    %14 = arith.mulf %5, %5 : vector<8x16xf32>
    %cst_5 = arith.constant dense<0.000000e+00> : vector<8xf32>
    %15 = vector.multi_reduction <add>, %14, %cst_5 [1] : vector<8x16xf32> to vector<8xf32>
    %16 = vector.shape_cast %15 : vector<8xf32> to vector<8x1xf32>
    %cst_6 = arith.constant 1.000000e-24 : f32
    %17 = vector.broadcast %cst_6 : f32 to vector<8x1xf32>
    %18 = arith.maximumf %16, %17 : vector<8x1xf32>
    %19 = math.rsqrt %18 : vector<8x1xf32>
    %20 = vector.broadcast %19 : vector<8x1xf32> to vector<8x16xf32>
    %21 = arith.mulf %5, %20 : vector<8x16xf32>
    %c0_7 = arith.constant 0 : index
    %c0_8 = arith.constant 0 : index
    %22 = vector.load %arg3[%c0_7, %c0_8] : memref<1x16xf32, #tpu.memory_space<vmem>>, vector<1x16xf32>
    %23 = vector.broadcast %22 : vector<1x16xf32> to vector<8x16xf32>
    %24 = arith.mulf %13, %23 : vector<8x16xf32>
    %cst_9 = arith.constant dense<0.000000e+00> : vector<8xf32>
    %25 = vector.multi_reduction <add>, %24, %cst_9 [1] : vector<8x16xf32> to vector<8xf32>
    %26 = vector.shape_cast %25 : vector<8xf32> to vector<8x1xf32>
    %27 = vector.broadcast %22 : vector<1x16xf32> to vector<8x16xf32>
    %28 = arith.mulf %21, %27 : vector<8x16xf32>
    %cst_10 = arith.constant dense<0.000000e+00> : vector<8xf32>
    %29 = vector.multi_reduction <add>, %28, %cst_10 [1] : vector<8x16xf32> to vector<8xf32>
    %30 = vector.shape_cast %29 : vector<8xf32> to vector<8x1xf32>
    %31 = arith.subf %30, %26 : vector<8x1xf32>
    %32 = math.exp %31 : vector<8x1xf32>
    %cst_11 = arith.constant 1.000000e+00 : f32
    %33 = vector.broadcast %cst_11 : f32 to vector<8x1xf32>
    %34 = arith.addf %33, %32 : vector<8x1xf32>
    %cst_12 = arith.constant 1.000000e+00 : f32
    %35 = vector.broadcast %cst_12 : f32 to vector<8x1xf32>
    %36 = arith.divf %35, %34 : vector<8x1xf32>
    %cst_13 = arith.constant 1.000000e+00 : f32
    %37 = vector.broadcast %cst_13 : f32 to vector<8x1xf32>
    %38 = arith.subf %37, %36 : vector<8x1xf32>
    %39 = vector.broadcast %36 : vector<8x1xf32> to vector<8x16xf32>
    %40 = arith.mulf %39, %13 : vector<8x16xf32>
    %41 = vector.broadcast %38 : vector<8x1xf32> to vector<8x16xf32>
    %42 = arith.mulf %41, %21 : vector<8x16xf32>
    %43 = arith.addf %40, %42 : vector<8x16xf32>
    %c0_14 = arith.constant 0 : index
    %c0_15 = arith.constant 0 : index
    %44 = vector.load %arg4[%c0_14, %c0_15] : memref<8x16xf32, #tpu.memory_space<vmem>>, vector<8x16xf32>
    tpu.vector_store %arg4[%c0_14, %c0_15], %43 {strides = array<i32>} : memref<8x16xf32, #tpu.memory_space<vmem>>, vector<8x16xf32>,
    return
  }
  func.func @transform_0(%arg0: i32) -> (i32, i32) {
    %c0_i32 = arith.constant 0 : i32
    %c0_i32_0 = arith.constant 0 : i32
    return %arg0, %c0_i32 : i32, i32
  }
  func.func @transform_1(%arg0: i32) -> (i32, i32) {
    %c0_i32 = arith.constant 0 : i32
    %c0_i32_0 = arith.constant 0 : i32
    %c0_i32_1 = arith.constant 0 : i32
    return %c0_i32, %c0_i32_0 : i32, i32
  }
  func.func @transform_2(%arg0: i32) -> (i32, i32) {
    %c0_i32 = arith.constant 0 : i32
    %c0_i32_0 = arith.constant 0 : i32
    %c0_i32_1 = arith.constant 0 : i32
    return %c0_i32, %c0_i32_0 : i32, i32
  }
  func.func @transform_3(%arg0: i32) -> (i32, i32) {
    %c0_i32 = arith.constant 0 : i32
    %c0_i32_0 = arith.constant 0 : i32
    return %arg0, %c0_i32 : i32, i32
  }
}

module attributes {stable_mosaic.version = 11 : i64} {
  func.func @_fused_and_views_kernel(%arg0: i32, %arg1: memref<8x32xf32, #tpu.memory_space<vmem>>, %arg2: memref<32x32xbf16, #tpu.memory_space<vmem>>, %arg3: memref<1x16xf32, #tpu.memory_space<vmem>>, %arg4: memref<8x16xf32, #tpu.memory_space<vmem>>, %arg5: memref<8x16xf32, #tpu.memory_space<vmem>>, %arg6: memref<8x16xf32, #tpu.memory_space<vmem>>) attributes {dimension_semantics = [#tpu.dimension_semantics<parallel>], iteration_bounds = array<i64: 1>, scalar_prefetch = 0 : i64, scratch_operands = 0 : i64, tpu.core_type = #tpu.core_type<tc>, window_params = [{transform_indices = @transform_0, window_bounds = array<i64: 8, 32>}, {pipeline_mode = #tpu.pipeline_mode<synchronous>, transform_indices = @transform_1, window_bounds = array<i64: 32, 32>}, {pipeline_mode = #tpu.pipeline_mode<synchronous>, transform_indices = @transform_2, window_bounds = array<i64: 1, 16>}, {transform_indices = @transform_3, window_bounds = array<i64: 8, 16>}, {transform_indices = @transform_4, window_bounds = array<i64: 8, 16>}, {transform_indices = @transform_5, window_bounds = array<i64: 8, 16>}]} {
    %c0 = arith.constant 0 : index
    %c0_0 = arith.constant 0 : index
    %0 = vector.load %arg1[%c0, %c0_0] : memref<8x32xf32, #tpu.memory_space<vmem>>, vector<8x32xf32>
    %1 = arith.truncf %0 : vector<8x32xf32> to vector<8x32xbf16>
    %c0_1 = arith.constant 0 : index
    %c0_2 = arith.constant 0 : index
    %2 = vector.load %arg2[%c0_1, %c0_2] : memref<32x32xbf16, #tpu.memory_space<vmem>>, vector<32x32xbf16>
    %cst = arith.constant dense<0.000000e+00> : vector<8x32xf32>
    %3 = tpu.matmul %1, %2, %cst {dimension_numbers = #tpu.dot_dimension_numbers<[1], [0], [0], [1], [0, 0, 1, 1], [], []>} : vector<8x32xbf16>, vector<32x32xbf16>, vector<8x32xf32> -> vector<8x32xf32>
    %4 = vector.extract_strided_slice %3 {offsets = [0, 0], sizes = [8, 16], strides = [1, 1]} : vector<8x32xf32> to vector<8x16xf32>
    %5 = vector.extract_strided_slice %3 {offsets = [0, 16], sizes = [8, 16], strides = [1, 1]} : vector<8x32xf32> to vector<8x16xf32>
    %6 = arith.mulf %4, %4 : vector<8x16xf32>
    %cst_3 = arith.constant dense<0.000000e+00> : vector<8xf32>
    %7 = vector.multi_reduction <add>, %6, %cst_3 [1] : vector<8x16xf32> to vector<8xf32>
    %8 = vector.shape_cast %7 : vector<8xf32> to vector<8x1xf32>
    %cst_4 = arith.constant 1.000000e-24 : f32
    %9 = vector.broadcast %cst_4 : f32 to vector<8x1xf32>
    %10 = arith.maximumf %8, %9 : vector<8x1xf32>
    %11 = math.rsqrt %10 : vector<8x1xf32>
    %12 = vector.broadcast %11 : vector<8x1xf32> to vector<8x16xf32>
    %13 = arith.mulf %4, %12 : vector<8x16xf32>
    %14 = arith.mulf %5, %5 : vector<8x16xf32>
    %cst_5 = arith.constant dense<0.000000e+00> : vector<8xf32>
    %15 = vector.multi_reduction <add>, %14, %cst_5 [1] : vector<8x16xf32> to vector<8xf32>
    %16 = vector.shape_cast %15 : vector<8xf32> to vector<8x1xf32>
    %cst_6 = arith.constant 1.000000e-24 : f32
    %17 = vector.broadcast %cst_6 : f32 to vector<8x1xf32>
    %18 = arith.maximumf %16, %17 : vector<8x1xf32>
    %19 = math.rsqrt %18 : vector<8x1xf32>
    %20 = vector.broadcast %19 : vector<8x1xf32> to vector<8x16xf32>
    %21 = arith.mulf %5, %20 : vector<8x16xf32>
    %c0_7 = arith.constant 0 : index
    %c0_8 = arith.constant 0 : index
    %22 = vector.load %arg3[%c0_7, %c0_8] : memref<1x16xf32, #tpu.memory_space<vmem>>, vector<1x16xf32>
    %23 = vector.broadcast %22 : vector<1x16xf32> to vector<8x16xf32>
    %24 = arith.mulf %13, %23 : vector<8x16xf32>
    %cst_9 = arith.constant dense<0.000000e+00> : vector<8xf32>
    %25 = vector.multi_reduction <add>, %24, %cst_9 [1] : vector<8x16xf32> to vector<8xf32>
    %26 = vector.shape_cast %25 : vector<8xf32> to vector<8x1xf32>
    %27 = vector.broadcast %22 : vector<1x16xf32> to vector<8x16xf32>
    %28 = arith.mulf %21, %27 : vector<8x16xf32>
    %cst_10 = arith.constant dense<0.000000e+00> : vector<8xf32>
    %29 = vector.multi_reduction <add>, %28, %cst_10 [1] : vector<8x16xf32> to vector<8xf32>
    %30 = vector.shape_cast %29 : vector<8xf32> to vector<8x1xf32>
    %31 = arith.subf %30, %26 : vector<8x1xf32>
    %32 = math.exp %31 : vector<8x1xf32>
    %cst_11 = arith.constant 1.000000e+00 : f32
    %33 = vector.broadcast %cst_11 : f32 to vector<8x1xf32>
    %34 = arith.addf %33, %32 : vector<8x1xf32>
    %cst_12 = arith.constant 1.000000e+00 : f32
    %35 = vector.broadcast %cst_12 : f32 to vector<8x1xf32>
    %36 = arith.divf %35, %34 : vector<8x1xf32>
    %cst_13 = arith.constant 1.000000e+00 : f32
    %37 = vector.broadcast %cst_13 : f32 to vector<8x1xf32>
    %38 = arith.subf %37, %36 : vector<8x1xf32>
    %39 = vector.broadcast %36 : vector<8x1xf32> to vector<8x16xf32>
    %40 = arith.mulf %39, %13 : vector<8x16xf32>
    %41 = vector.broadcast %38 : vector<8x1xf32> to vector<8x16xf32>
    %42 = arith.mulf %41, %21 : vector<8x16xf32>
    %43 = arith.addf %40, %42 : vector<8x16xf32>
    %c0_14 = arith.constant 0 : index
    %c0_15 = arith.constant 0 : index
    %44 = vector.load %arg4[%c0_14, %c0_15] : memref<8x16xf32, #tpu.memory_space<vmem>>, vector<8x16xf32>
    tpu.vector_store %arg4[%c0_14, %c0_15], %43 {strides = array<i32>} : memref<8x16xf32, #tpu.memory_space<vmem>>, vector<8x16xf32>,
    %c0_16 = arith.constant 0 : index
    %c0_17 = arith.constant 0 : index
    %45 = vector.load %arg5[%c0_16, %c0_17] : memref<8x16xf32, #tpu.memory_space<vmem>>, vector<8x16xf32>
    tpu.vector_store %arg5[%c0_16, %c0_17], %13 {strides = array<i32>} : memref<8x16xf32, #tpu.memory_space<vmem>>, vector<8x16xf32>,
    %c0_18 = arith.constant 0 : index
    %c0_19 = arith.constant 0 : index
    %46 = vector.load %arg6[%c0_18, %c0_19] : memref<8x16xf32, #tpu.memory_space<vmem>>, vector<8x16xf32>
    tpu.vector_store %arg6[%c0_18, %c0_19], %21 {strides = array<i32>} : memref<8x16xf32, #tpu.memory_space<vmem>>, vector<8x16xf32>,
    return
  }
  func.func @transform_0(%arg0: i32) -> (i32, i32) {
    %c0_i32 = arith.constant 0 : i32
    %c0_i32_0 = arith.constant 0 : i32
    return %arg0, %c0_i32 : i32, i32
  }
  func.func @transform_1(%arg0: i32) -> (i32, i32) {
    %c0_i32 = arith.constant 0 : i32
    %c0_i32_0 = arith.constant 0 : i32
    %c0_i32_1 = arith.constant 0 : i32
    return %c0_i32, %c0_i32_0 : i32, i32
  }
  func.func @transform_2(%arg0: i32) -> (i32, i32) {
    %c0_i32 = arith.constant 0 : i32
    %c0_i32_0 = arith.constant 0 : i32
    %c0_i32_1 = arith.constant 0 : i32
    return %c0_i32, %c0_i32_0 : i32, i32
  }
  func.func @transform_3(%arg0: i32) -> (i32, i32) {
    %c0_i32 = arith.constant 0 : i32
    %c0_i32_0 = arith.constant 0 : i32
    return %arg0, %c0_i32 : i32, i32
  }
  func.func @transform_4(%arg0: i32) -> (i32, i32) {
    %c0_i32 = arith.constant 0 : i32
    %c0_i32_0 = arith.constant 0 : i32
    return %arg0, %c0_i32 : i32, i32
  }
  func.func @transform_5(%arg0: i32) -> (i32, i32) {
    %c0_i32 = arith.constant 0 : i32
    %c0_i32_0 = arith.constant 0 : i32
    return %arg0, %c0_i32 : i32, i32
  }
}

</mosaic_0001>

<bundles_post_ra>
// kernel: _multiview_forward_impl.3
= control target key start
LH: loop header
LB: loop body
LE: loop exit
PB: predicated region body
PF: predicated region fallthrough
CT: control target
= control target key end

     0   :  { %11 = vsyncpa [#allocation3], 0  ;;  %s364_s0 = inlined_call_operand.vmem [shape: f32[8,32], index: 0, kind: input, shape index: {}]   ;;  %s365_s1 = inlined_call_operand.vmem [shape: bf16[32,32], index: 1, kind: input, shape index: {}]   ;;  %s366_s2 = inlined_call_operand.vmem [shape: f32[1,16], index: 2, kind: input, shape index: {}]   ;;  %s367_s3 = inlined_call_operand.hbm [shape: f32[8,16], index: 3, kind: output, shape index: {0}]   ;;  %s368_s4 = inlined_call_operand.hbm [shape: f32[8,16], index: 4, kind: output, shape index: {1}]   ;;  %s369_s5 = inlined_call_operand.hbm [shape: f32[8,16], index: 5, kind: output, shape index: {2}]  }
   0x1   :  { %v201_v0 = vld [vmem:[%s365_s1 + $0x8] sm:$0xff]  ;;  %v207_v1 = vld [vmem:[%s366_s2] ss:$0 sm:$0xff] }
   0x2   :  { %12 = vsyncpa [#allocation5], 0  ;;  %48 = vmatpush.bf16.msra.mxu0 %v201_v0  ;;  %v200_v2 = vld [vmem:[%s365_s1] sm:$0xff]  ;;  %s292_s26 = smov 16   ;;  %vm38_vm0 = vcmask 261120   ;;  %vm56_vm1 = vcmask 130048  }
   0x3   :  { %v20_v3 = vld [vmem:[%s364_s0] sm:$0xff]  ;;  %99 = vrot.lane.b32.xlu1 %v207_v1, %s292_s26  ;;  %s293_s2 = smov 112   ;;  %s294_s0 = smov [#allocation4]  }
   0x4   :  { %v21_v4 = vpack.c.bf16 %v20_v3, %v20_v3  ;;  %s160_s1 = sshll.u32 %s294_s0, 4  ;;  %s162_s29 = sshll.u32 %s368_s4, 4  ;;  %s161_s1 = int_to_ptr.vmem [resolvable:$true] %s160_s1  ;;  %s163_s29 = int_to_ptr.hbm [resolvable:$true] %s162_s29 }
   0x5   :  { %s295_s30 = smov [#allocation6]   ;;  %s173_s9 = sshll.u32 %s369_s5, 4  ;;  %s174_s9 = int_to_ptr.hbm [resolvable:$true] %s173_s9 }
   0x6   :  { %49 = vmatpush.bf16.msra.mxu0 %v200_v2  ;;  %s171_s6 = sshll.u32 %s295_s30, 4  ;;  %s296_s4 = smov [#allocation2]   ;;  %s172_s6 = int_to_ptr.vmem [resolvable:$true] %s171_s6 }
   0x7   :  { %s149_s10 = sshll.u32 %s296_s4, 4  ;;  %s151_s13 = sshll.u32 %s367_s3, 4  ;;  %s150_s10 = int_to_ptr.vmem [resolvable:$true] %s149_s10  ;;  %s152_s13 = int_to_ptr.hbm [resolvable:$true] %s151_s13 }
   0x9   :  { %199 = vmatmul.msk.bf16.vlgmr.msra.gmra.mxu0 %vm38_vm0, %v21_v4 }
  0x75   :  { %v100_v9 = vpop.permute.xlu1 %99 }
  0x86   :  { %v51_v5 = vpop.f32.mrf.mxu0 }
  0x87   :  { %v55_v6 = vmul.f32 %v51_v5, %v51_v5 }
  0x89   :  { %73 = vrot.lane.b32.xlu0 %v55_v6, %s293_s2  ;;  %v57_v7 = vsel %vm56_vm1, %v55_v6, 0.0 }
  0x8a   :  { %58 = vadd.xlane.f32.xlu1 %v57_v7 }
  0x8e   :  { %v53_v8 = vpop.f32.mrf.mxu0 }
  0xfb   :  { %v74_v10 = vpop.permute.xlu0 %73 }
  0xfc   :  { %v76_v11 = vsel %vm56_vm1, %v74_v10, 0.0 }
  0xfd   :  { %77 = vadd.xlane.f32.xlu0 %v76_v11  ;;  %v59_v12 = vpop.xlane.xlu1 %58 }
  0xfe   :  { %v60_v13 = vmax.f32 %v59_v12, 1e-24 }
 0x100   :  { %208 = vrsqrt.f32 %v60_v13  ;;  %vm67_vm3 = vweird.f32 %v60_v13 }
 0x106   :  { %v209_v14 = vpop.eup %208 }
 0x107   :  { %v62_v15 = vmul.f32 %v209_v14, %v60_v13  ;;  %vm68_vm2 = vweird.f32 %v209_v14 }
 0x108   :  { %vm69_vm4 = vmor %vm67_vm3, %vm68_vm2 }
 0x109   :  { %v63_v16 = vmul.f32 %v209_v14, %v62_v15 }
 0x10b   :  { %v64_v17 = vmul.f32 0.5, %v63_v16 }
 0x10d   :  { %v65_v18 = vsub.f32 1.5, %v64_v17 }
 0x10f   :  { %v66_v19 = vmul.f32 %v209_v14, %v65_v18 }
 0x111   :  { %v70_v20 = vsel %vm69_vm4, %v209_v14, %v66_v19 }
 0x112   :  { %v342_v21 = vmul.f32 %v70_v20, %v51_v5 }
 0x114   :  { %138 = vst.msk [vmem:[#allocation4] sm:$0xff] %vm56_vm1, %v342_v21  ;;  %v95_v33 = vmul.f32 %v207_v1, %v342_v21 }
 0x115   :  { %165 = dma.vmem_to_hbm [thread:$0]  %s161_s1, 128, %s163_s29, [#allocation5]  }
 0x116   :  { %v96_v34 = vsel %vm56_vm1, %v95_v33, 0.0 }
 0x170   :  { %v78_v22 = vpop.xlane.xlu0 %77 }
 0x171   :  { %v79_v23 = vmax.f32 %v78_v22, 1e-24 }
 0x173   :  { %210 = vrsqrt.f32 %v79_v23  ;;  %vm86_vm6 = vweird.f32 %v79_v23 }
 0x179   :  { %v211_v24 = vpop.eup %210 }
 0x17a   :  { %v81_v25 = vmul.f32 %v211_v24, %v79_v23  ;;  %vm87_vm5 = vweird.f32 %v211_v24 }
 0x17b   :  { %vm88_vm7 = vmor %vm86_vm6, %vm87_vm5 }
 0x17c   :  { %v82_v26 = vmul.f32 %v211_v24, %v81_v25 }
 0x17e   :  { %v83_v27 = vmul.f32 0.5, %v82_v26 }
 0x180   :  { %v84_v28 = vsub.f32 1.5, %v83_v27 }
 0x182   :  { %v85_v29 = vmul.f32 %v211_v24, %v84_v28 }
 0x184   :  { %v89_v30 = vsel %vm88_vm7, %v211_v24, %v85_v29 }
 0x185   :  { %v90_v31 = vmul.f32 %v89_v30, %v51_v5 }
 0x187   :  { %140 = vrot.lane.b32.xlu1 %v90_v31, %s293_s2  ;;  %v102_v32 = vmul.f32 %v100_v9, %v90_v31 }
 0x189   :  { %104 = vrot.lane.b32.xlu2 %v102_v32, %s293_s2 }
 0x1b2   :  { %97 = vadd.xlane.f32.xlu2 %v96_v34 }
 0x1e3   :  { %v105_v35 = vpop.permute.xlu2 %104 }
 0x1e4   :  { %v107_v36 = vsel %vm56_vm1, %v105_v35, 0.0 }
 0x1e5   :  { %108 = vadd.xlane.f32.xlu2 %v107_v36 }
 0x1f9   :  { %v141_v37 = vpop.permute.xlu1 %140 }
 0x1fa   :  { %143 = vst.msk [vmem:[#allocation6] sm:$0xff] %vm56_vm1, %v141_v37 }
 0x1fb   :  { %176 = dma.vmem_to_hbm [thread:$0]  %s172_s6, 128, %s174_s9, [#allocation5]  }
 0x225   :  { %v98_v38 = vpop.xlane.xlu2 %97 }
 0x258   :  { %v109_v39 = vpop.xlane.xlu2 %108 }
 0x259   :  { %v110_v40 = vsub.f32 %v109_v39, %v98_v38 }
 0x25b   :  { %v111_v41 = vmul.f32 1.442695, %v110_v40 }
 0x25d   :  { %212 = vpow2.f32 %v111_v41 }
 0x263   :  { %v213_v42 = vpop.eup %212 }
 0x264   :  { %v113_v43 = vadd.f32 1.0, %v213_v42 }
 0x266   :  { %214 = vrcp.f32 %v113_v43  ;;  %v125_v47 = vand.u32 2147483648, %v113_v43  ;;  %v123_v49 = vand.u32 2147483647, %v113_v43  ;;  %vm119_vm9 = vweird.f32 %v113_v43 }
 0x268   :  { %v126_v51 = vor.u32 1.1754944e-38, %v125_v47  ;;  %vm124_vm11 = vcmp.eq.f32.partialorder %v123_v49, 8.507059e+37 }
 0x26c   :  { %v215_v44 = vpop.eup %214 }
 0x26d   :  { %v115_v45 = vmul.f32 %v215_v44, %v113_v43  ;;  %vm120_vm8 = vweird.f32 %v215_v44 }
 0x26e   :  { %vm121_vm10 = vmor %vm119_vm9, %vm120_vm8 }
 0x26f   :  { %v116_v46 = vsub.f32 1.0, %v115_v45 }
 0x271   :  { %v117_v48 = vmul.f32 %v215_v44, %v116_v46 }
 0x273   :  { %v118_v50 = vadd.f32 %v215_v44, %v117_v48 }
 0x275   :  { %v122_v52 = vsel %vm121_vm10, %v215_v44, %v118_v50 }
 0x276   :  { %v127_v53 = vsel %vm124_vm11, %v126_v51, %v122_v52 }
 0x277   :  { %v129_v54 = vsub.f32 1.0, %v127_v53  ;;  %v130_v56 = vmul.f32 %v127_v53, %v342_v21 }
 0x279   :  { %v131_v55 = vmul.f32 %v129_v54, %v90_v31 }
 0x27b   :  { %133 = vrot.lane.b32.xlu0 %v131_v55, %s293_s2 }
 0x2ed   :  { %v134_v57 = vpop.permute.xlu0 %133 }
 0x2ee   :  { %v136_v58 = vadd.f32 %v134_v57, %v130_v56 }
 0x2f0   :  { %137 = vst.msk [vmem:[#allocation2] sm:$0xff] %vm56_vm1, %v136_v58 }
 0x2f1   :  { %154 = dma.vmem_to_hbm [thread:$0]  %s150_s10, 128, %s152_s13, [#allocation3]  }
 0x2f2   :  { %288 = dma.done.wait [#allocation3], 128  }
 0x2f3   :  { %289 = vsyncadd [#allocation3], 4294967168 }
 0x2f4   :  { %290 = dma.done.wait [#allocation5], 256  }
 0x2f5   :  { %291 = vsyncadd [#allocation5], 4294967040 }
 0x2f6   :  { %189 = vsyncpa [#allocation3], 1 }
 0x2f7   :  { %190 = vsyncpa [#allocation5], 1 }

// kernel: _multiview_forward_impl.4
= control target key start
LH: loop header
LB: loop body
LE: loop exit
PB: predicated region body
PF: predicated region fallthrough
CT: control target
= control target key end

     0   :  { %s245_s0 = inlined_call_operand.vmem [shape: f32[8,32], index: 0, kind: input, shape index: {}]   ;;  %s246_s1 = inlined_call_operand.vmem [shape: bf16[32,32], index: 1, kind: input, shape index: {}]   ;;  %s247_s2 = inlined_call_operand.vmem [shape: f32[1,16], index: 2, kind: input, shape index: {}]   ;;  %s248_s3 = inlined_call_operand.hbm [shape: f32[8,16], index: 3, kind: output, shape index: {}]  }
   0x1   :  { %v160_v0 = vld [vmem:[%s246_s1 + $0x8] sm:$0xff]  ;;  %v164_v1 = vld [vmem:[%s247_s2] ss:$0 sm:$0xff] }
   0x2   :  { %8 = vsyncpa [#allocation3], 0  ;;  %44 = vmatpush.bf16.msra.mxu0 %v160_v0  ;;  %v159_v2 = vld [vmem:[%s246_s1] sm:$0xff]  ;;  %s199_s20 = smov 16   ;;  %vm34_vm0 = vcmask 261120   ;;  %vm52_vm1 = vcmask 130048  }
   0x3   :  { %v16_v3 = vld [vmem:[%s245_s0] sm:$0xff]  ;;  %95 = vrot.lane.b32.xlu1 %v164_v1, %s199_s20  ;;  %s200_s2 = smov 112   ;;  %s201_s0 = smov [#allocation2]  }
   0x4   :  { %v17_v4 = vpack.c.bf16 %v16_v3, %v16_v3  ;;  %s139_s1 = sshll.u32 %s201_s0, 4  ;;  %s141_s23 = sshll.u32 %s248_s3, 4  ;;  %s140_s1 = int_to_ptr.vmem [resolvable:$true] %s139_s1  ;;  %s142_s23 = int_to_ptr.hbm [resolvable:$true] %s141_s23 }
   0x6   :  { %45 = vmatpush.bf16.msra.mxu0 %v159_v2 }
   0x9   :  { %158 = vmatmul.msk.bf16.vlgmr.msra.gmra.mxu0 %vm34_vm0, %v17_v4 }
  0x75   :  { %v96_v13 = vpop.permute.xlu1 %95 }
  0x86   :  { %v47_v5 = vpop.f32.mrf.mxu0 }
  0x87   :  { %v51_v6 = vmul.f32 %v47_v5, %v47_v5 }
  0x89   :  { %69 = vrot.lane.b32.xlu0 %v51_v6, %s200_s2  ;;  %v53_v7 = vsel %vm52_vm1, %v51_v6, 0.0 }
  0x8a   :  { %54 = vadd.xlane.f32.xlu1 %v53_v7 }
  0x8e   :  { %v49_v8 = vpop.f32.mrf.mxu0 }
  0xfb   :  { %v70_v9 = vpop.permute.xlu0 %69 }
  0xfc   :  { %v72_v10 = vsel %vm52_vm1, %v70_v9, 0.0 }
  0xfd   :  { %73 = vadd.xlane.f32.xlu0 %v72_v10  ;;  %v55_v19 = vpop.xlane.xlu1 %54 }
  0xfe   :  { %v56_v22 = vmax.f32 %v55_v19, 1e-24 }
 0x100   :  { %vm63_vm6 = vweird.f32 %v56_v22 }
 0x170   :  { %v74_v11 = vpop.xlane.xlu0 %73 }
 0x171   :  { %v75_v12 = vmax.f32 %v74_v11, 1e-24 }
 0x173   :  { %165 = vrsqrt.f32 %v75_v12  ;;  %vm82_vm3 = vweird.f32 %v75_v12 }
 0x174   :  { %167 = vrsqrt.f32 %v56_v22 }
 0x179   :  { %v166_v14 = vpop.eup %165 }
 0x17a   :  { %v77_v15 = vmul.f32 %v166_v14, %v75_v12  ;;  %vm83_vm2 = vweird.f32 %v166_v14  ;;  %v168_v25 = vpop.eup %167 }
 0x17b   :  { %vm84_vm4 = vmor %vm82_vm3, %vm83_vm2  ;;  %v58_v26 = vmul.f32 %v168_v25, %v56_v22  ;;  %vm64_vm5 = vweird.f32 %v168_v25 }
 0x17c   :  { %v78_v16 = vmul.f32 %v166_v14, %v77_v15  ;;  %vm65_vm7 = vmor %vm63_vm6, %vm64_vm5 }
 0x17d   :  { %v59_v27 = vmul.f32 %v168_v25, %v58_v26 }
 0x17e   :  { %v79_v17 = vmul.f32 0.5, %v78_v16 }
 0x17f   :  { %v60_v28 = vmul.f32 0.5, %v59_v27 }
 0x180   :  { %v80_v18 = vsub.f32 1.5, %v79_v17 }
 0x181   :  { %v61_v29 = vsub.f32 1.5, %v60_v28 }
 0x182   :  { %v81_v20 = vmul.f32 %v166_v14, %v80_v18 }
 0x183   :  { %v62_v30 = vmul.f32 %v168_v25, %v61_v29 }
 0x184   :  { %v85_v21 = vsel %vm84_vm4, %v166_v14, %v81_v20 }
 0x185   :  { %v86_v23 = vmul.f32 %v85_v21, %v47_v5  ;;  %v66_v31 = vsel %vm65_vm7, %v168_v25, %v62_v30 }
 0x186   :  { %v67_v32 = vmul.f32 %v66_v31, %v47_v5 }
 0x187   :  { %v98_v24 = vmul.f32 %v96_v13, %v86_v23 }
 0x188   :  { %v91_v33 = vmul.f32 %v164_v1, %v67_v32 }
 0x189   :  { %100 = vrot.lane.b32.xlu2 %v98_v24, %s200_s2 }
 0x18a   :  { %v92_v34 = vsel %vm52_vm1, %v91_v33, 0.0 }
 0x1b2   :  { %93 = vadd.xlane.f32.xlu2 %v92_v34 }
 0x1e3   :  { %v101_v35 = vpop.permute.xlu2 %100 }
 0x1e4   :  { %v103_v36 = vsel %vm52_vm1, %v101_v35, 0.0 }
 0x1e5   :  { %104 = vadd.xlane.f32.xlu2 %v103_v36 }
 0x225   :  { %v94_v37 = vpop.xlane.xlu2 %93 }
 0x258   :  { %v105_v38 = vpop.xlane.xlu2 %104 }
 0x259   :  { %v106_v39 = vsub.f32 %v105_v38, %v94_v37 }
 0x25b   :  { %v107_v40 = vmul.f32 1.442695, %v106_v39 }
 0x25d   :  { %169 = vpow2.f32 %v107_v40 }
 0x263   :  { %v170_v41 = vpop.eup %169 }
 0x264   :  { %v109_v42 = vadd.f32 1.0, %v170_v41 }
 0x266   :  { %171 = vrcp.f32 %v109_v42  ;;  %v121_v46 = vand.u32 2147483648, %v109_v42  ;;  %v119_v48 = vand.u32 2147483647, %v109_v42  ;;  %vm115_vm9 = vweird.f32 %v109_v42 }
 0x268   :  { %v122_v50 = vor.u32 1.1754944e-38, %v121_v46  ;;  %vm120_vm11 = vcmp.eq.f32.partialorder %v119_v48, 8.507059e+37 }
 0x26c   :  { %v172_v43 = vpop.eup %171 }
 0x26d   :  { %v111_v44 = vmul.f32 %v172_v43, %v109_v42  ;;  %vm116_vm8 = vweird.f32 %v172_v43 }
 0x26e   :  { %vm117_vm10 = vmor %vm115_vm9, %vm116_vm8 }
 0x26f   :  { %v112_v45 = vsub.f32 1.0, %v111_v44 }
 0x271   :  { %v113_v47 = vmul.f32 %v172_v43, %v112_v45 }
 0x273   :  { %v114_v49 = vadd.f32 %v172_v43, %v113_v47 }
 0x275   :  { %v118_v51 = vsel %vm117_vm10, %v172_v43, %v114_v49 }
 0x276   :  { %v123_v52 = vsel %vm120_vm11, %v122_v50, %v118_v51 }
 0x277   :  { %v125_v53 = vsub.f32 1.0, %v123_v52  ;;  %v126_v55 = vmul.f32 %v123_v52, %v67_v32 }
 0x279   :  { %v127_v54 = vmul.f32 %v125_v53, %v86_v23 }
 0x27b   :  { %129 = vrot.lane.b32.xlu0 %v127_v54, %s200_s2 }
 0x2ed   :  { %v130_v56 = vpop.permute.xlu0 %129 }
 0x2ee   :  { %v132_v57 = vadd.f32 %v130_v56, %v126_v55 }
 0x2f0   :  { %133 = vst.msk [vmem:[#allocation2] sm:$0xff] %vm52_vm1, %v132_v57 }
 0x2f1   :  { %144 = dma.vmem_to_hbm [thread:$0]  %s140_s1, 128, %s142_s23, [#allocation3]  }
 0x2f2   :  { %197 = dma.done.wait [#allocation3], 128  }
 0x2f3   :  { %198 = vsyncadd [#allocation3], 4294967168 }
 0x2f4   :  { %149 = vsyncpa [#allocation3], 1 }

</bundles_post_ra>
